<compile_context>
chip_gen: v7x
topology: tpu7x:2x2x1
jax: 0.10.0
libtpu: 0.0.40
codegen_flags: <defaults>
</compile_context>

<pallas_src>
import math

import jax
import jax.numpy as jnp
from jax.experimental import pallas as pl
from jax.experimental.pallas import tpu as pltpu

_LANE = 128


def _copy_kernel(x_ref, o_ref):
    # Pure memcpy of one lane/sublane-dense block.
    o_ref[...] = x_ref[...]


def _sublane_pack(dtype):
    # Rows per full vreg: 8 for 32-bit, 16 for 16-bit, 32 for 8-bit dtypes.
    itemsize = jnp.dtype(dtype).itemsize
    return 8 * max(1, 4 // itemsize)


def _pick_cols(total, sub, max_cols):
    """Largest multiple-of-128 divisor of `total` that is <= max_cols,
    preferring divisors whose row count (total // cols) is a multiple of the
    sublane pack.  Returns None if total is not a multiple of 128."""
    if total % _LANE != 0:
        return None
    hi = min(max_cols, total)
    hi -= hi % _LANE
    best_any = None
    c = hi
    while c >= _LANE:
        if total % c == 0:
            if best_any is None:
                best_any = c
            if (total // c) % sub == 0:
                return c
        c -= _LANE
    return best_any


def _pallas_copy_2d(x2, *, sub, target_block_bytes, vmem_limit_bytes,
                    prefer_two_row_blocks=True):
    """Lane-dense tiled copy of a 2-D array through a Pallas kernel."""
    rows, cols = x2.shape
    itemsize = jnp.dtype(x2.dtype).itemsize

    # Lane (column) tile: whole width if a full sublane-pack of rows fits the
    # block budget (or the width is already sub-128), else the largest
    # multiple of 128 that fits (clamped to >= 128).
    row_bytes = cols * itemsize
    if cols <= _LANE or row_bytes * sub <= target_block_bytes:
        tile_c = cols
    else:
        tile_c = max(_LANE,
                     (target_block_bytes // (sub * itemsize) // _LANE) * _LANE)
        tile_c = min(tile_c, (cols // _LANE) * _LANE)

    # Sublane (row) tile: as many full sublane-packs as fit the block budget.
    tile_r_budget = max(sub,
                        (target_block_bytes // (tile_c * itemsize) // sub) * sub)
    tile_r = min(rows, tile_r_budget)

    # v7x: make sure at least one parallel axis has >= 2 blocks so both
    # TensorCores get work.  Only split when it can be done at full sublane
    # granularity.  Neutral on v5e/v6e (single TC).
    if (prefer_two_row_blocks
            and pl.cdiv(rows, tile_r) == 1
            and pl.cdiv(cols, tile_c) == 1
            and rows >= 2 * sub):
        half = (rows + 1) // 2
        cand = max(sub, ((half + sub - 1) // sub) * sub)
        if cand < rows:
            tile_r = cand

    grid = (pl.cdiv(rows, tile_r), pl.cdiv(cols, tile_c))

    return pl.pallas_call(
        _copy_kernel,
        out_shape=jax.ShapeDtypeStruct((rows, cols), x2.dtype),
        grid_spec=pltpu.PrefetchScalarGridSpec(
            num_scalar_prefetch=0,
            grid=grid,
            in_specs=[pl.BlockSpec((tile_r, tile_c), lambda i, j: (i, j))],
            out_specs=pl.BlockSpec((tile_r, tile_c), lambda i, j: (i, j)),
        ),
        compiler_params=pltpu.CompilerParams(
            # Pure copy: every block is independent -> shard across TCs.
            dimension_semantics=("parallel", "parallel"),
            vmem_limit_bytes=vmem_limit_bytes,
        ),
        cost_estimate=pl.CostEstimate(
            flops=0,
            transcendentals=0,
            bytes_accessed=2 * rows * cols * itemsize,
        ),
    )(x2)


def flatten(x, *, target_block_bytes=4 * 1024 * 1024, max_cols=16384,
            vmem_limit_bytes=32 * 1024 * 1024):
    """Pallas equivalent of torch's x.view(x.shape[0], -1)."""
    n = x.shape[0]
    flat = math.prod(x.shape[1:]) if len(x.shape) > 1 else 1
    total = n * flat
    sub = _sublane_pack(x.dtype)

    # Preferred path: re-slab the flattened total into a (rows, cols) layout
    # with cols a multiple of 128 (full lanes) and, when possible, rows a
    # multiple of the sublane pack (full vregs).  Reshapes are free.
    cols = _pick_cols(total, sub, max_cols)
    if cols is not None:
        rows = total // cols
        x2 = jnp.reshape(x, (rows, cols))
        out2 = _pallas_copy_2d(
            x2, sub=sub, target_block_bytes=target_block_bytes,
            vmem_limit_bytes=vmem_limit_bytes)
        return jnp.reshape(out2, (n, flat))

    # Fallback (total not a multiple of 128): tile (n, flat) directly; the
    # lane tile is either the full flat dim or a >=128 multiple of 128, so
    # only trailing blocks are masked.
    x2 = jnp.reshape(x, (n, flat))
    return _pallas_copy_2d(
        x2, sub=sub, target_block_bytes=target_block_bytes,
        vmem_limit_bytes=vmem_limit_bytes)


if __name__ == "__main__":
    key = jax.random.PRNGKey(0)
    # Small NCHW input consistent with a typical conv feature map.
    x = jax.random.normal(key, (2, 4, 16, 16), dtype=jnp.float32)

    out = flatten(x)
    out = jax.block_until_ready(out)

    # Reference: plain reshape (torch .view on contiguous tensor).
    ref = x.reshape(x.shape[0], -1)
    assert out.shape == ref.shape, (out.shape, ref.shape)
    assert out.dtype == ref.dtype
    assert jnp.array_equal(out, ref), "mismatch vs reference reshape"

    print("KERNEL_OK")
</pallas_src>

<mosaic_0001>
module attributes {stable_mosaic.version = 11 : i64} {
  func.func @_copy_kernel(%arg0: i32, %arg1: i32, %arg2: memref<8x256xf32, #tpu.memory_space<vmem>>, %arg3: memref<8x256xf32, #tpu.memory_space<vmem>>) attributes {dimension_semantics = [#tpu.dimension_semantics<parallel>, #tpu.dimension_semantics<parallel>], iteration_bounds = array<i64: 1, 1>, scalar_prefetch = 0 : i64, scratch_operands = 0 : i64, tpu.core_type = #tpu.core_type<tc>, window_params = [{transform_indices = @transform_0, window_bounds = array<i64: 8, 256>}, {transform_indices = @transform_1, window_bounds = array<i64: 8, 256>}]} {
    %c0 = arith.constant 0 : index
    %c0_0 = arith.constant 0 : index
    %0 = vector.load %arg2[%c0, %c0_0] : memref<8x256xf32, #tpu.memory_space<vmem>>, vector<8x256xf32>
    %c0_1 = arith.constant 0 : index
    %c0_2 = arith.constant 0 : index
    %1 = vector.load %arg3[%c0_1, %c0_2] : memref<8x256xf32, #tpu.memory_space<vmem>>, vector<8x256xf32>
    tpu.vector_store %arg3[%c0_1, %c0_2], %0 {strides = array<i32>} : memref<8x256xf32, #tpu.memory_space<vmem>>, vector<8x256xf32>,
    return
  }
  func.func @transform_0(%arg0: i32, %arg1: i32) -> (i32, i32) {
    %c0_i32 = arith.constant 0 : i32
    return %arg0, %arg1 : i32, i32
  }
  func.func @transform_1(%arg0: i32, %arg1: i32) -> (i32, i32) {
    %c0_i32 = arith.constant 0 : i32
    return %arg0, %arg1 : i32, i32
  }
}

</mosaic_0001>

<bundles_post_ra>
// kernel: tpu_custom_call.1
= control target key start
LH: loop header
LB: loop body
LE: loop exit
PB: predicated region body
PF: predicated region fallthrough
CT: control target
= control target key end

     0   :  { %6 = vsyncpa [#allocation3], 0  ;;  %s126_s0 = inlined_call_operand.hbm [shape: f32[8,256], index: 0, kind: input, shape index: {}]   ;;  %s127_s1 = inlined_call_operand.hbm [shape: f32[8,256], index: 1, kind: output, shape index: {}]  }
   0x1   :  { %7 = vsyncpa [#allocation4], 0  ;;  %s90_s6 = smov [#allocation2]   ;;  %s42_s10 = scalar_lea.hbm %s126_s0, 256 }
   0x2   :  { %s14_s7 = sshll.u32 %s90_s6, 4  ;;  %p43_p0 = scmp.ne.s32.totalorder %s126_s0, %s42_s10  ;;  %s15_s7 = int_to_ptr.vmem [resolvable:$true] %s14_s7 }
   0x3   :  { %p46_p1 = scmp.lt.u32.totalorder %s42_s10, %s126_s0 }
   0x5   :  { %p48_p2 = pnand %p46_p1, %p43_p0 }
   0x7   :  { %51 = shalt.err (!%p48_p2)
}
   0x8   :  { %s52_s15 = scalar_lea.vmem %s15_s7, 256  ;;  %p57_p4 = scmp.lt.s32.totalorder %s15_s7, %s15_s7 }
   0x9   :  { %p53_p3 = scmp.ne.s32.totalorder %s15_s7, %s52_s15  ;;  %p58_p5 = scmp.lt.s32.totalorder %s52_s15, %s52_s15 }
   0xb   :  { %p59_p6 = por %p58_p5, %p57_p4 }
   0xd   :  { %p60_p7 = pnand %p59_p6, %p53_p3 }
   0xf   :  { %63 = shalt.err (!%p60_p7)
}
  0x10   :  { %17 = dma.hbm_to_vmem [thread:$0]  %s126_s0, 256, %s15_s7, [#allocation3]  }
  0x11   :  { %86 = dma.done.wait [#allocation3], 256  }
  0x12   :  { %87 = vsyncadd [#allocation3], 4294967040  ;;  %s91_s18 = smov [#allocation5]   ;;  %v21_v0 = vld [vmem:[#allocation2] sm:$0xff]  ;;  %v22_v1 = vld [vmem:[#allocation2 + $0x8] sm:$0xff] }
  0x13   :  { %s31_s19 = sshll.u32 %s91_s18, 4  ;;  %23 = vst [vmem:[#allocation5] sm:$0xff] %v21_v0  ;;  %24 = vst [vmem:[#allocation5 + $0x8] sm:$0xff] %v22_v1  ;;  %s32_s19 = int_to_ptr.vmem [resolvable:$true] %s31_s19 }
  0x14   :  { %s64_s20 = scalar_lea.vmem %s32_s19, 256  ;;  %p69_p9 = scmp.lt.s32.totalorder %s32_s19, %s32_s19 }
  0x15   :  { %p65_p8 = scmp.ne.s32.totalorder %s32_s19, %s64_s20  ;;  %p70_p10 = scmp.lt.s32.totalorder %s64_s20, %s64_s20 }
  0x17   :  { %p71_p11 = por %p70_p10, %p69_p9 }
  0x19   :  { %p72_p12 = pnand %p71_p11, %p65_p8 }
  0x1b   :  { %75 = shalt.err (!%p72_p12)
}
  0x1c   :  { %s76_s0 = scalar_lea.hbm %s127_s1, 256 }
  0x1d   :  { %p77_p13 = scmp.ne.s32.totalorder %s127_s1, %s76_s0  ;;  %p80_p0 = scmp.lt.u32.totalorder %s76_s0, %s127_s1 }
  0x1f   :  { %p82_p1 = pnand %p80_p0, %p77_p13 }
  0x21   :  { %85 = shalt.err (!%p82_p1)
}
  0x22   :  { %34 = dma.vmem_to_hbm [thread:$0]  %s32_s19, 256, %s127_s1, [#allocation4]  }
  0x23   :  { %88 = dma.done.wait [#allocation4], 256  }
  0x24   :  { %89 = vsyncadd [#allocation4], 4294967040 }
  0x25   :  { %38 = vsyncpa [#allocation3], 1 }
  0x26   :  { %39 = vsyncpa [#allocation4], 1 }

</bundles_post_ra>
